<compile_context>
chip_gen: v7x
topology: tpu7x:2x2x1
jax: 0.10.0
libtpu: 0.0.40
codegen_flags: <defaults>
</compile_context>

<pallas_src>
import jax
import jax.numpy as jnp
from jax.experimental import pallas as pl
from jax.experimental.pallas import tpu as pltpu


def _abs_pos_emb_kernel(emb_ref, o_ref):
    # Positions are arange(S): the per-tile "gather" is a contiguous tile copy.
    # Full-vreg load + unmasked lane-dense store (dim is a multiple of 128).
    o_ref[...] = emb_ref[...]


def _pick_row_tile(seq_len):
    # Largest row tile (multiple of 8 sublanes) that divides the seq length.
    # 256-512 rows is the sweet spot for HBM-roofline pipelining; small test
    # shapes just fall back to the full extent (always a legal block dim).
    for cand in (512, 256, 128, 64, 32, 16, 8):
        if seq_len % cand == 0:
            return cand
    return seq_len


def absolute_positional_embedding(x, emb_table):
    """Pallas equivalent of AbsolutePositionalEmbedding.forward.

    x:         (B, S) or (B, S, ...) — only x.shape[1] (the sequence length)
               is used, exactly like the PyTorch module.
    emb_table: (max_seq_len, dim) — the nn.Embedding weight.
    returns:   (S, dim) == emb_table[arange(S)]
    """
    seq_len = int(x.shape[1])
    max_seq_len, dim = emb_table.shape
    assert seq_len <= max_seq_len, "sequence longer than max_seq_len"

    tile = _pick_row_tile(seq_len)
    grid = (seq_len // tile,)

    nbytes = seq_len * dim * emb_table.dtype.itemsize
    cost = pl.CostEstimate(flops=0, transcendentals=0,
                           bytes_accessed=2 * nbytes)  # read + write

    return pl.pallas_call(
        _abs_pos_emb_kernel,
        out_shape=jax.ShapeDtypeStruct((seq_len, dim), emb_table.dtype),
        grid=grid,
        in_specs=[
            # Block i of the output reads rows [i*tile, (i+1)*tile) of the
            # table — the "gather" for contiguous positions lives entirely in
            # the index_map, so no in-kernel index math / relayout is needed.
            pl.BlockSpec((tile, dim), lambda i: (i, 0)),
        ],
        out_specs=pl.BlockSpec((tile, dim), lambda i: (i, 0)),
        compiler_params=pltpu.CompilerParams(
            dimension_semantics=("parallel",),       # megacore-splittable
            vmem_limit_bytes=32 * 1024 * 1024,       # explicit, safe on v7x
        ),
        cost_estimate=cost,
    )(emb_table)


def _reference(x, emb_table):
    """Pure-JAX re-implementation of the PyTorch forward (for checking)."""
    seq_len = x.shape[1]
    t = jnp.arange(seq_len)
    return emb_table[t]


if __name__ == "__main__":
    key = jax.random.PRNGKey(0)
    B, S = 2, 16
    max_seq_len, dim = 64, 128   # dim chosen lane-aligned (multiple of 128)

    kx, ke = jax.random.split(key, 2)
    # x plays the role of the token-id tensor fed to the module; only its
    # shape matters for this forward.
    x = jax.random.randint(kx, (B, S), 0, 1000, dtype=jnp.int32)
    emb_table = jax.random.normal(ke, (max_seq_len, dim), dtype=jnp.float32)

    out = absolute_positional_embedding(x, emb_table)
    out = jax.block_until_ready(out)

    ref = _reference(x, emb_table)
    assert out.shape == (S, dim), f"bad shape {out.shape}"
    assert jnp.allclose(out, ref, atol=0.0, rtol=0.0), \
        f"max abs err {jnp.max(jnp.abs(out - ref))}"

    print("KERNEL_OK")
</pallas_src>

<mosaic_0001>
module attributes {stable_mosaic.version = 11 : i64} {
  func.func @_abs_pos_emb_kernel(%arg0: i32, %arg1: memref<16x128xf32, #tpu.memory_space<vmem>>, %arg2: memref<16x128xf32, #tpu.memory_space<vmem>>) attributes {dimension_semantics = [#tpu.dimension_semantics<parallel>], iteration_bounds = array<i64: 1>, scalar_prefetch = 0 : i64, scratch_operands = 0 : i64, tpu.core_type = #tpu.core_type<tc>, window_params = [{transform_indices = @transform_0, window_bounds = array<i64: 16, 128>}, {transform_indices = @transform_1, window_bounds = array<i64: 16, 128>}]} {
    %c0 = arith.constant 0 : index
    %c0_0 = arith.constant 0 : index
    %0 = vector.load %arg1[%c0, %c0_0] : memref<16x128xf32, #tpu.memory_space<vmem>>, vector<16x128xf32>
    %c0_1 = arith.constant 0 : index
    %c0_2 = arith.constant 0 : index
    %1 = vector.load %arg2[%c0_1, %c0_2] : memref<16x128xf32, #tpu.memory_space<vmem>>, vector<16x128xf32>
    tpu.vector_store %arg2[%c0_1, %c0_2], %0 {strides = array<i32>} : memref<16x128xf32, #tpu.memory_space<vmem>>, vector<16x128xf32>,
    return
  }
  func.func @transform_0(%arg0: i32) -> (i32, i32) {
    %c0_i32 = arith.constant 0 : i32
    %c0_i32_0 = arith.constant 0 : i32
    return %arg0, %c0_i32 : i32, i32
  }
  func.func @transform_1(%arg0: i32) -> (i32, i32) {
    %c0_i32 = arith.constant 0 : i32
    %c0_i32_0 = arith.constant 0 : i32
    return %arg0, %c0_i32 : i32, i32
  }
}

</mosaic_0001>

<bundles_post_ra>
// kernel: tpu_custom_call.1
= control target key start
LH: loop header
LB: loop body
LE: loop exit
PB: predicated region body
PF: predicated region fallthrough
CT: control target
= control target key end

     0   :  { %6 = vsyncpa [#allocation3], 0  ;;  %s137_s0 = inlined_call_operand.hbm [shape: f32[64,128], index: 0, kind: input, shape index: {}]   ;;  %s138_s1 = inlined_call_operand.hbm [shape: f32[16,128], index: 1, kind: output, shape index: {}]  }
   0x1   :  { %7 = vsyncpa [#allocation4], 0  ;;  %s96_s6 = smov [#allocation2]   ;;  %s48_s10 = scalar_lea.hbm %s137_s0, 256 }
   0x2   :  { %s13_s7 = sshll.u32 %s96_s6, 4  ;;  %p49_p0 = scmp.ne.s32.totalorder %s137_s0, %s48_s10  ;;  %s14_s7 = int_to_ptr.vmem [resolvable:$true] %s13_s7 }
   0x3   :  { %s50_s15 = scalar_lea.hbm %s137_s0, 1024  ;;  %p52_p2 = scmp.lt.u32.totalorder %s48_s10, %s137_s0 }
   0x4   :  { %p51_p1 = scmp.lt.u32.totalorder %s50_s15, %s48_s10 }
   0x6   :  { %p53_p3 = por %p52_p2, %p51_p1 }
   0x8   :  { %p54_p4 = pnand %p53_p3, %p49_p0 }
   0xa   :  { %57 = shalt.err (!%p54_p4)
}
   0xb   :  { %s58_s18 = scalar_lea.vmem %s14_s7, 256  ;;  %p63_p6 = scmp.lt.s32.totalorder %s14_s7, %s14_s7 }
   0xc   :  { %p59_p5 = scmp.ne.s32.totalorder %s14_s7, %s58_s18  ;;  %p64_p7 = scmp.lt.s32.totalorder %s58_s18, %s58_s18 }
   0xe   :  { %p65_p8 = por %p64_p7, %p63_p6 }
  0x10   :  { %p66_p9 = pnand %p65_p8, %p59_p5 }
  0x12   :  { %69 = shalt.err (!%p66_p9)
}
  0x13   :  { %s97_s19 = smov 128   ;;  %s98_s20 = smov 8  }
  0x14   :  { %19 = dma.hbm_to_vmem [thread:$0]  %s137_s0, 256, %s14_s7, [#allocation3], %s97_s19, %s97_s19, %s98_s20  }
  0x15   :  { %92 = dma.done.wait [#allocation3], 256  }
  0x16   :  { %93 = vsyncadd [#allocation3], 4294967040  ;;  %s99_s23 = smov [#allocation5]   ;;  %v23_v0 = vld [vmem:[#allocation2] sm:$0xff]  ;;  %v24_v1 = vld [vmem:[#allocation2 + $0x8] sm:$0xff] }
  0x17   :  { %s32_s24 = sshll.u32 %s99_s23, 4  ;;  %25 = vst [vmem:[#allocation5] sm:$0xff] %v23_v0  ;;  %26 = vst [vmem:[#allocation5 + $0x8] sm:$0xff] %v24_v1  ;;  %s33_s24 = int_to_ptr.vmem [resolvable:$true] %s32_s24 }
  0x18   :  { %s70_s25 = scalar_lea.vmem %s33_s24, 256  ;;  %p75_p11 = scmp.lt.s32.totalorder %s33_s24, %s33_s24 }
  0x19   :  { %p71_p10 = scmp.ne.s32.totalorder %s33_s24, %s70_s25  ;;  %p76_p12 = scmp.lt.s32.totalorder %s70_s25, %s70_s25 }
  0x1b   :  { %p77_p13 = por %p76_p12, %p75_p11 }
  0x1d   :  { %p78_p0 = pnand %p77_p13, %p71_p10 }
  0x1f   :  { %81 = shalt.err (!%p78_p0)
}
  0x20   :  { %s82_s0 = scalar_lea.hbm %s138_s1, 256 }
  0x21   :  { %p83_p1 = scmp.ne.s32.totalorder %s138_s1, %s82_s0  ;;  %p86_p2 = scmp.lt.u32.totalorder %s82_s0, %s138_s1 }
  0x23   :  { %p88_p3 = pnand %p86_p2, %p83_p1 }
  0x25   :  { %91 = shalt.err (!%p88_p3)
}
  0x26   :  { %38 = dma.vmem_to_hbm [thread:$0]  %s33_s24, 256, %s138_s1, [#allocation4], %s97_s19, %s97_s19, %s98_s20  }
  0x27   :  { %94 = dma.done.wait [#allocation4], 256  }
  0x28   :  { %95 = vsyncadd [#allocation4], 4294967040 }
  0x29   :  { %42 = vsyncpa [#allocation3], 1 }
  0x2a   :  { %43 = vsyncpa [#allocation4], 1 }

</bundles_post_ra>
